<compile_context>
chip_gen: v5e
topology: v5e:2x2
jax: 0.10.0
libtpu: 0.0.40
codegen_flags: <defaults>
</compile_context>

<pallas_src>
import functools

import jax
import jax.numpy as jnp
from jax.experimental import pallas as pl
from jax.experimental.pallas import tpu as pltpu


def _lane_pad(n):
    return max(128, ((n + 127) // 128) * 128)


def _pick_tm(n):
    # Prefer >= 2 row blocks so v7x's two TensorCores both get work on the
    # "parallel" axis.
    for t in (512, 256, 128, 64, 32, 16, 8):
        if t <= n // 2 and n % t == 0:
            return t
    return n


def _pick_tk(n):
    # Big adjacency slabs amortize per-step overhead and keep HBM BW near peak;
    # for small/medium graphs use a single k step (tk == N).
    if n <= 4096:
        return n
    for t in (4096, 2048, 1024, 512, 256, 128):
        if n % t == 0:
            return t
    return n


def _gin_layer_kernel(x_hi_ref, x_lo_ref, adj_ref, w1_ref, b1_ref, w2_ref,
                      b2_ref, out_ref, acc_ref, *, eps, tm, tk):
    i = pl.program_id(0)
    k = pl.program_id(1)

    @pl.when(k == 0)
    def _():
        acc_ref[...] = jnp.zeros_like(acc_ref)

    # int8 adjacency tile (exact 0/1) widened to bf16 on the VPU; aggregation
    # matmul then runs on the fast bf16 MXU path on v5e/v6e/v7x.
    adj = adj_ref[...].astype(jnp.bfloat16)                       # (tm, tk)

    col = pl.multiple_of(k * tk, tk)
    x_hi = x_hi_ref[pl.ds(col, tk), :]                            # (tk, Fp) bf16
    x_lo = x_lo_ref[pl.ds(col, tk), :]
    # 2-term bf16 split of f32 x -> near-f32 accuracy from bf16 operands.
    acc_ref[...] += (
        jnp.dot(adj, x_hi, preferred_element_type=jnp.float32)
        + jnp.dot(adj, x_lo, preferred_element_type=jnp.float32))

    @pl.when(k == pl.num_programs(1) - 1)
    def _():
        row = pl.multiple_of(i * tm, tm)
        x_self = (x_hi_ref[pl.ds(row, tm), :].astype(jnp.float32)
                  + x_lo_ref[pl.ds(row, tm), :].astype(jnp.float32))
        agg = acc_ref[...] + (1.0 + eps) * x_self                 # (tm, Fp)
        h = jnp.dot(agg, w1_ref[...], preferred_element_type=jnp.float32)
        h = jnp.maximum(h + b1_ref[...], 0.0)                     # inner ReLU
        o = jnp.dot(h, w2_ref[...], preferred_element_type=jnp.float32)
        o = jnp.maximum(o + b2_ref[...], 0.0)                     # outer ReLU
        out_ref[...] = o.astype(out_ref.dtype)


def gin_layer(x, adj_t_i8, w1, b1, w2, b2, *, eps=0.0, tm=None, tk=None):
    """One GINConv layer + outer ReLU.

    x        : (N, Fp) f32, Fp a multiple of 128, columns >= w1.shape[1] are 0
    adj_t_i8 : (N, N) int8, already transposed ([j, i] = [adj[i, j] > 0])
    w1       : (H, fin), w2: (H, H), b1/b2: (H,)   (torch Linear layout)
    returns  : (N, Hp) f32 with Hp = lane-padded H; pad columns are exactly 0.
    """
    N, fp = x.shape
    H, fin = w1.shape
    assert fin <= fp and fp % 128 == 0

    if tm is None:
        tm = _pick_tm(N)
    if tk is None:
        tk = _pick_tk(N)
    assert N % tm == 0 and N % tk == 0

    hp = _lane_pad(H)
    f32 = jnp.float32

    # Pre-transpose + zero-pad weights so the epilogue matmuls, the VMEM
    # accumulator and the output store are all lane-dense (unmasked vst);
    # the zero pads contribute exact zeros and are tiny / resident.
    w1t = jnp.pad(w1.T.astype(f32), ((0, fp - fin), (0, hp - H)))  # (Fp, Hp)
    b1r = jnp.pad(b1.astype(f32), (0, hp - H)).reshape(1, hp)
    w2t = jnp.pad(w2.T.astype(f32), ((0, hp - H), (0, hp - H)))    # (Hp, Hp)
    b2r = jnp.pad(b2.astype(f32), (0, hp - H)).reshape(1, hp)

    # bf16 hi/lo split of x (x ~= hi + lo, ~2^-16 relative error).
    x = x.astype(f32)
    x_hi = x.astype(jnp.bfloat16)
    x_lo = (x - x_hi.astype(f32)).astype(jnp.bfloat16)

    grid = (N // tm, N // tk)

    out = pl.pallas_call(
        functools.partial(_gin_layer_kernel, eps=eps, tm=tm, tk=tk),
        out_shape=jax.ShapeDtypeStruct((N, hp), jnp.float32),
        grid_spec=pltpu.PrefetchScalarGridSpec(
            num_scalar_prefetch=0,
            grid=grid,
            in_specs=[
                pl.BlockSpec((N, fp), lambda i, k: (0, 0)),    # x hi (resident)
                pl.BlockSpec((N, fp), lambda i, k: (0, 0)),    # x lo (resident)
                pl.BlockSpec((tm, tk), lambda i, k: (i, k)),   # adj^T (int8)
                pl.BlockSpec((fp, hp), lambda i, k: (0, 0)),   # W1^T (padded)
                pl.BlockSpec((1, hp), lambda i, k: (0, 0)),    # b1
                pl.BlockSpec((hp, hp), lambda i, k: (0, 0)),   # W2^T (padded)
                pl.BlockSpec((1, hp), lambda i, k: (0, 0)),    # b2
            ],
            out_specs=pl.BlockSpec((tm, hp), lambda i, k: (i, 0)),
            scratch_shapes=[pltpu.VMEM((tm, fp), jnp.float32)],
        ),
        compiler_params=pltpu.CompilerParams(
            dimension_semantics=("parallel", "arbitrary"),
            vmem_limit_bytes=48 * 1024 * 1024,   # safe on v7x's 64 MiB VMEM
        ),
    )(x_hi, x_lo, adj_t_i8, w1t, b1r, w2t, b2r)

    return out


def gin_forward(feat, adj, params, *, eps=0.0, tm=None, tk=None):
    """feat: (1, N, F) or (N, F); adj: (1, N, N) or (N, N);
    params: list of (w1, b1, w2, b2) per GINConv layer (torch Linear layout)."""
    x = feat[0] if feat.ndim == 3 else feat          # torch.squeeze
    a = adj[0] if adj.ndim == 3 else adj
    N, fin0 = x.shape

    # Edge list is built from adj > 0 (unweighted) and messages are summed at
    # the target node  =>  sum_i [adj[i, j] > 0] * x[i]  ==  adj_bin.T @ x.
    # Binarize once to int8 (exact 0/1) so each layer streams only 1 B/entry.
    adj_t = (a > 0).astype(jnp.int8).T               # (N, N) int8, transposed
    # TODO(synk): fold this transpose into the kernel index_map ((k, i) blocks
    # + lhs-transposed dot_general) once that path is guaranteed on all Mosaic
    # versions in use; the binarize pass itself is unavoidable.

    fp0 = _lane_pad(fin0)
    x = jnp.pad(x.astype(jnp.float32), ((0, 0), (0, fp0 - fin0)))

    H = params[-1][0].shape[0]
    for (w1, b1, w2, b2) in params:
        x = gin_layer(x, adj_t, w1, b1, w2, b2, eps=eps, tm=tm, tk=tk)
    return x[None, :, :H]                            # torch.unsqueeze(x, 0)


def gin_reference(feat, adj, params, eps=0.0):
    """Pure-JAX reference matching the PyTorch GIN forward."""
    x = feat[0] if feat.ndim == 3 else feat
    a = adj[0] if adj.ndim == 3 else adj
    a_bin = (a > 0).astype(jnp.float32)
    hp = jax.lax.Precision.HIGHEST
    for (w1, b1, w2, b2) in params:
        agg = (1.0 + eps) * x + jnp.dot(a_bin.T, x, precision=hp)
        h = jax.nn.relu(jnp.dot(agg, w1.T, precision=hp) + b1)
        h = jnp.dot(h, w2.T, precision=hp) + b2
        x = jax.nn.relu(h)
    return x[None]


if __name__ == "__main__":
    # Small shapes consistent with the module: N nodes, ft_size, hidden_dim.
    N, ft_size, hidden_dim, num_layers = 256, 48, 64, 2

    key = jax.random.PRNGKey(0)
    keys = jax.random.split(key, 2 + 4 * num_layers)
    k_feat, k_adj, k_w = keys[0], keys[1], keys[2:]

    feat = jax.random.normal(k_feat, (1, N, ft_size), dtype=jnp.float32)
    # Symmetric 0/1 adjacency, ~10% density (as produced by GGAD preprocessing).
    upper = (jax.random.uniform(k_adj, (N, N)) < 0.05).astype(jnp.float32)
    adj = jnp.clip(upper + upper.T, 0.0, 1.0)[None]              # (1, N, N)

    params = []
    fin = ft_size
    for layer in range(num_layers):
        kw1, kb1, kw2, kb2 = k_w[4 * layer: 4 * layer + 4]
        w1 = (jax.random.normal(kw1, (hidden_dim, fin)) /
              jnp.sqrt(fin)).astype(jnp.float32)
        b1 = (0.1 * jax.random.normal(kb1, (hidden_dim,))).astype(jnp.float32)
        w2 = (jax.random.normal(kw2, (hidden_dim, hidden_dim)) /
              jnp.sqrt(hidden_dim)).astype(jnp.float32)
        b2 = (0.1 * jax.random.normal(kb2, (hidden_dim,))).astype(jnp.float32)
        params.append((w1, b1, w2, b2))
        fin = hidden_dim

    ref = gin_reference(feat, adj, params)

    # Default tiles: tm = N/2 (two "parallel" row blocks), tk = N (single k step).
    out = jax.block_until_ready(gin_forward(feat, adj, params))
    assert out.shape == (1, N, hidden_dim), out.shape
    err = float(jnp.max(jnp.abs(out - ref)))
    assert jnp.allclose(out, ref, atol=2e-3, rtol=2e-3), f"default tiles: max err {err}"

    # Smaller tk exercises the k-accumulation (zero-init / epilogue) path.
    out2 = jax.block_until_ready(gin_forward(feat, adj, params, tm=128, tk=128))
    err2 = float(jnp.max(jnp.abs(out2 - ref)))
    assert jnp.allclose(out2, ref, atol=2e-3, rtol=2e-3), f"tiled k: max err {err2}"

    print("KERNEL_OK")
</pallas_src>

<mosaic_0001>
module attributes {stable_mosaic.version = 11 : i64} {
  func.func @_gin_layer_kernel(%arg0: i32, %arg1: i32, %arg2: memref<256x128xbf16, #tpu.memory_space<vmem>>, %arg3: memref<256x128xbf16, #tpu.memory_space<vmem>>, %arg4: memref<128x256xi8, #tpu.memory_space<vmem>>, %arg5: memref<128x128xf32, #tpu.memory_space<vmem>>, %arg6: memref<1x128xf32, #tpu.memory_space<vmem>>, %arg7: memref<128x128xf32, #tpu.memory_space<vmem>>, %arg8: memref<1x128xf32, #tpu.memory_space<vmem>>, %arg9: memref<128x128xf32, #tpu.memory_space<vmem>>, %arg10: memref<128x128xf32, #tpu.memory_space<vmem>>) attributes {dimension_semantics = [#tpu.dimension_semantics<parallel>, #tpu.dimension_semantics<arbitrary>], iteration_bounds = array<i64: 2, 1>, scalar_prefetch = 0 : i64, scratch_operands = 1 : i64, tpu.core_type = #tpu.core_type<tc>, window_params = [{pipeline_mode = #tpu.pipeline_mode<synchronous>, transform_indices = @transform_0, window_bounds = array<i64: 256, 128>}, {pipeline_mode = #tpu.pipeline_mode<synchronous>, transform_indices = @transform_1, window_bounds = array<i64: 256, 128>}, {transform_indices = @transform_2, window_bounds = array<i64: 128, 256>}, {pipeline_mode = #tpu.pipeline_mode<synchronous>, transform_indices = @transform_3, window_bounds = array<i64: 128, 128>}, {pipeline_mode = #tpu.pipeline_mode<synchronous>, transform_indices = @transform_4, window_bounds = array<i64: 1, 128>}, {pipeline_mode = #tpu.pipeline_mode<synchronous>, transform_indices = @transform_5, window_bounds = array<i64: 128, 128>}, {pipeline_mode = #tpu.pipeline_mode<synchronous>, transform_indices = @transform_6, window_bounds = array<i64: 1, 128>}, {transform_indices = @transform_7, window_bounds = array<i64: 128, 128>}]} {
    %c0_i32 = arith.constant 0 : i32
    %0 = arith.cmpi eq, %arg1, %c0_i32 : i32
    %1 = arith.extui %0 : i1 to i32
    %c0_i32_0 = arith.constant 0 : i32
    %2 = arith.cmpi ne, %1, %c0_i32_0 : i32
    scf.if %2 {
      %cst_11 = arith.constant 0.000000e+00 : f32
      %20 = vector.broadcast %cst_11 : f32 to vector<128x128xf32>
      %c0_12 = arith.constant 0 : index
      %c0_13 = arith.constant 0 : index
      %21 = vector.load %arg10[%c0_12, %c0_13] : memref<128x128xf32, #tpu.memory_space<vmem>>, vector<128x128xf32>
      tpu.vector_store %arg10[%c0_12, %c0_13], %20 {strides = array<i32>} : memref<128x128xf32, #tpu.memory_space<vmem>>, vector<128x128xf32>,
    } else {
    }
    %c0 = arith.constant 0 : index
    %c0_1 = arith.constant 0 : index
    %3 = vector.load %arg4[%c0, %c0_1] : memref<128x256xi8, #tpu.memory_space<vmem>>, vector<128x256xi8>
    %4 = arith.sitofp %3 : vector<128x256xi8> to vector<128x256xbf16>
    %c256_i32 = arith.constant 256 : i32
    %5 = arith.muli %arg1, %c256_i32 : i32
    %6 = tpu.assume_multiple %5, 256 : i32
    %7 = arith.index_cast %6 : i32 to index
    %c0_2 = arith.constant 0 : index
    %8 = vector.load %arg2[%7, %c0_2] : memref<256x128xbf16, #tpu.memory_space<vmem>>, vector<256x128xbf16>
    %9 = arith.index_cast %6 : i32 to index
    %c0_3 = arith.constant 0 : index
    %10 = vector.load %arg3[%9, %c0_3] : memref<256x128xbf16, #tpu.memory_space<vmem>>, vector<256x128xbf16>
    %c0_4 = arith.constant 0 : index
    %c0_5 = arith.constant 0 : index
    %11 = vector.load %arg10[%c0_4, %c0_5] : memref<128x128xf32, #tpu.memory_space<vmem>>, vector<128x128xf32>
    %cst = arith.constant dense<0.000000e+00> : vector<128x128xf32>
    %12 = tpu.matmul %4, %8, %cst {dimension_numbers = #tpu.dot_dimension_numbers<[1], [0], [0], [1], [0, 0, 1, 1], [], []>} : vector<128x256xbf16>, vector<256x128xbf16>, vector<128x128xf32> -> vector<128x128xf32>
    %cst_6 = arith.constant dense<0.000000e+00> : vector<128x128xf32>
    %13 = tpu.matmul %4, %10, %cst_6 {dimension_numbers = #tpu.dot_dimension_numbers<[1], [0], [0], [1], [0, 0, 1, 1], [], []>} : vector<128x256xbf16>, vector<256x128xbf16>, vector<128x128xf32> -> vector<128x128xf32>
    %14 = arith.addf %12, %13 : vector<128x128xf32>
    %15 = arith.addf %11, %14 : vector<128x128xf32>
    %c0_7 = arith.constant 0 : index
    %c0_8 = arith.constant 0 : index
    %16 = vector.load %arg10[%c0_7, %c0_8] : memref<128x128xf32, #tpu.memory_space<vmem>>, vector<128x128xf32>
    tpu.vector_store %arg10[%c0_7, %c0_8], %15 {strides = array<i32>} : memref<128x128xf32, #tpu.memory_space<vmem>>, vector<128x128xf32>,
    %c0_i32_9 = arith.constant 0 : i32
    %17 = arith.cmpi eq, %arg1, %c0_i32_9 : i32
    %18 = arith.extui %17 : i1 to i32
    %c0_i32_10 = arith.constant 0 : i32
    %19 = arith.cmpi ne, %18, %c0_i32_10 : i32
    scf.if %19 {
      %c128_i32 = arith.constant 128 : i32
      %20 = arith.muli %arg0, %c128_i32 : i32
      %21 = tpu.assume_multiple %20, 128 : i32
      %22 = arith.index_cast %21 : i32 to index
      %c0_11 = arith.constant 0 : index
      %23 = vector.load %arg2[%22, %c0_11] : memref<256x128xbf16, #tpu.memory_space<vmem>>, vector<128x128xbf16>
      %24 = arith.extf %23 : vector<128x128xbf16> to vector<128x128xf32>
      %25 = arith.index_cast %21 : i32 to index
      %c0_12 = arith.constant 0 : index
      %26 = vector.load %arg3[%25, %c0_12] : memref<256x128xbf16, #tpu.memory_space<vmem>>, vector<128x128xbf16>
      %27 = arith.extf %26 : vector<128x128xbf16> to vector<128x128xf32>
      %28 = arith.addf %24, %27 : vector<128x128xf32>
      %c0_13 = arith.constant 0 : index
      %c0_14 = arith.constant 0 : index
      %29 = vector.load %arg10[%c0_13, %c0_14] : memref<128x128xf32, #tpu.memory_space<vmem>>, vector<128x128xf32>
      %cst_15 = arith.constant 1.000000e+00 : f32
      %30 = vector.broadcast %cst_15 : f32 to vector<128x128xf32>
      %31 = arith.mulf %30, %28 : vector<128x128xf32>
      %32 = arith.addf %29, %31 : vector<128x128xf32>
      %c0_16 = arith.constant 0 : index
      %c0_17 = arith.constant 0 : index
      %33 = vector.load %arg5[%c0_16, %c0_17] : memref<128x128xf32, #tpu.memory_space<vmem>>, vector<128x128xf32>
      %cst_18 = arith.constant dense<0.000000e+00> : vector<128x128xf32>
      %34 = tpu.matmul %32, %33, %cst_18 {dimension_numbers = #tpu.dot_dimension_numbers<[1], [0], [0], [1], [0, 0, 1, 1], [], []>} : vector<128x128xf32>, vector<128x128xf32>, vector<128x128xf32> -> vector<128x128xf32>
      %c0_19 = arith.constant 0 : index
      %c0_20 = arith.constant 0 : index
      %35 = vector.load %arg6[%c0_19, %c0_20] : memref<1x128xf32, #tpu.memory_space<vmem>>, vector<1x128xf32>
      %36 = vector.broadcast %35 : vector<1x128xf32> to vector<128x128xf32>
      %37 = arith.addf %34, %36 : vector<128x128xf32>
      %cst_21 = arith.constant 0.000000e+00 : f32
      %38 = vector.broadcast %cst_21 : f32 to vector<128x128xf32>
      %39 = arith.maximumf %37, %38 : vector<128x128xf32>
      %c0_22 = arith.constant 0 : index
      %c0_23 = arith.constant 0 : index
      %40 = vector.load %arg7[%c0_22, %c0_23] : memref<128x128xf32, #tpu.memory_space<vmem>>, vector<128x128xf32>
      %cst_24 = arith.constant dense<0.000000e+00> : vector<128x128xf32>
      %41 = tpu.matmul %39, %40, %cst_24 {dimension_numbers = #tpu.dot_dimension_numbers<[1], [0], [0], [1], [0, 0, 1, 1], [], []>} : vector<128x128xf32>, vector<128x128xf32>, vector<128x128xf32> -> vector<128x128xf32>
      %c0_25 = arith.constant 0 : index
      %c0_26 = arith.constant 0 : index
      %42 = vector.load %arg8[%c0_25, %c0_26] : memref<1x128xf32, #tpu.memory_space<vmem>>, vector<1x128xf32>
      %43 = vector.broadcast %42 : vector<1x128xf32> to vector<128x128xf32>
      %44 = arith.addf %41, %43 : vector<128x128xf32>
      %cst_27 = arith.constant 0.000000e+00 : f32
      %45 = vector.broadcast %cst_27 : f32 to vector<128x128xf32>
      %46 = arith.maximumf %44, %45 : vector<128x128xf32>
      %c0_28 = arith.constant 0 : index
      %c0_29 = arith.constant 0 : index
      %47 = vector.load %arg9[%c0_28, %c0_29] : memref<128x128xf32, #tpu.memory_space<vmem>>, vector<128x128xf32>
      tpu.vector_store %arg9[%c0_28, %c0_29], %46 {strides = array<i32>} : memref<128x128xf32, #tpu.memory_space<vmem>>, vector<128x128xf32>,
    } else {
    }
    return
  }
  func.func @transform_0(%arg0: i32, %arg1: i32) -> (i32, i32) {
    %c0_i32 = arith.constant 0 : i32
    %c0_i32_0 = arith.constant 0 : i32
    %c0_i32_1 = arith.constant 0 : i32
    return %c0_i32, %c0_i32_0 : i32, i32
  }
  func.func @transform_1(%arg0: i32, %arg1: i32) -> (i32, i32) {
    %c0_i32 = arith.constant 0 : i32
    %c0_i32_0 = arith.constant 0 : i32
    %c0_i32_1 = arith.constant 0 : i32
    return %c0_i32, %c0_i32_0 : i32, i32
  }
  func.func @transform_2(%arg0: i32, %arg1: i32) -> (i32, i32) {
    %c0_i32 = arith.constant 0 : i32
    return %arg0, %arg1 : i32, i32
  }
  func.func @transform_3(%arg0: i32, %arg1: i32) -> (i32, i32) {
    %c0_i32 = arith.constant 0 : i32
    %c0_i32_0 = arith.constant 0 : i32
    %c0_i32_1 = arith.constant 0 : i32
    return %c0_i32, %c0_i32_0 : i32, i32
  }
  func.func @transform_4(%arg0: i32, %arg1: i32) -> (i32, i32) {
    %c0_i32 = arith.constant 0 : i32
    %c0_i32_0 = arith.constant 0 : i32
    %c0_i32_1 = arith.constant 0 : i32
    return %c0_i32, %c0_i32_0 : i32, i32
  }
  func.func @transform_5(%arg0: i32, %arg1: i32) -> (i32, i32) {
    %c0_i32 = arith.constant 0 : i32
    %c0_i32_0 = arith.constant 0 : i32
    %c0_i32_1 = arith.constant 0 : i32
    return %c0_i32, %c0_i32_0 : i32, i32
  }
  func.func @transform_6(%arg0: i32, %arg1: i32) -> (i32, i32) {
    %c0_i32 = arith.constant 0 : i32
    %c0_i32_0 = arith.constant 0 : i32
    %c0_i32_1 = arith.constant 0 : i32
    return %c0_i32, %c0_i32_0 : i32, i32
  }
  func.func @transform_7(%arg0: i32, %arg1: i32) -> (i32, i32) {
    %c0_i32 = arith.constant 0 : i32
    %c0_i32_0 = arith.constant 0 : i32
    return %arg0, %c0_i32 : i32, i32
  }
}

</mosaic_0001>

<bundles_post_ra>
// kernel: tpu_custom_call.1
= control target key start
LH: loop header
LB: loop body
LE: loop exit
PB: predicated region body
PF: predicated region fallthrough
CT: control target
= control target key end

     0   :  { %s2498_s0 = inlined_call_operand.hbm [shape: bf16[256,128], index: 0, kind: input, shape index: {}]   ;;  %s2499_s1 = inlined_call_operand.hbm [shape: bf16[256,128], index: 1, kind: input, shape index: {}]   ;;  %s2500_s2 = inlined_call_operand.hbm [shape: s8[256,256], index: 2, kind: input, shape index: {}]   ;;  %s2501_s3 = inlined_call_operand.hbm [shape: f32[128,128], index: 3, kind: input, shape index: {}]   ;;  %s2502_s4 = inlined_call_operand.vmem [shape: f32[1,128], index: 4, kind: input, shape index: {}]   ;;  %s2503_s5 = inlined_call_operand.hbm [shape: f32[128,128], index: 5, kind: input, shape index: {}]   ;;  %s2504_s6 = inlined_call_operand.vmem [shape: f32[1,128], index: 6, kind: input, shape index: {}]   ;;  %s2505_s7 = inlined_call_operand.hbm [shape: f32[256,128], index: 7, kind: output, shape index: {}]  }
   0x1   :  { %2507 = sst [smem:[#allocation20_spill]] %s2498_s0 }
   0x2   :  { %2508 = sst [smem:[#allocation21_spill]] %s2499_s1 }
   0x3   :  { %2509 = sst [smem:[#allocation22_spill]] %s2501_s3 }
   0x4   :  { %2510 = sst [smem:[#allocation23_spill]] %s2503_s5 }
   0x5   :  { %12 = vsyncpa [#allocation4], 0 }
   0x6   :  { %13 = vsyncpa [#allocation7], 0 }
   0x7   :  { %14 = vsyncpa [#allocation11], 0 }
   0x8   :  { %15 = vsyncpa [#allocation5], 0 }
   0x9   :  { %17 = vsyncpa [#allocation5 + $0x1], 0  ;;  %s2183_s24 = smov 0   ;;  %s2185_s25 = smov 0  }
   0xa   :  { %s2187_s26 = smov 0   ;;  %s2189_s27 = smov 0  }
   0xb   :  { %s2191_s28 = smov 0   ;;  %s2193_s29 = smov 0  }
   0xc LB: > { %s2214_s30 = sadd.s32 4294967295, %s2129_s29   ;;  %s1485_s8 = sadd.s32 4294967294, %s2129_s29   ;;  %s2129_s29 = sphi %s2193_s29, %s23_s29   ;;  %s2125_s28 = sphi %s2191_s28, %s2527_s28   ;;  %s2121_s27 = sphi %s2189_s27, %s2526_s27   ;;  %s2117_s26 = sphi %s2187_s26, %s2525_s26   ;;  %s2113_s25 = sphi %s2185_s25, %s2524_s25   ;;  %s2109_s24 = sphi %s2183_s24, %s2523_s24  }
   0xd   : > { %p99_p0 = scmp.ne.s32.totalorder %s2113_s25, %s2109_s24  ;;  %p100_p1 = scmp.eq.s32.totalorder %s2214_s30, 0 }
   0xe   : > { %p207_p2 = scmp.eq.s32.totalorder %s2214_s30, 1  ;;  %p213_p3 = scmp.eq.s32.totalorder %s1485_s8, 1 }
   0xf   : > { %p2223_p4 = por %p100_p1, %p99_p0  ;;  %p1486_p5 = scmp.ge.s32.totalorder %s2129_s29, 1 }
  0x10   : > { %p2228_p6 = por %p213_p3, %p99_p0  ;;  %p220_p7 = scmp.lt.s32.totalorder %s2129_s29, 3 }
  0x11   : > { %s2513_s0 = sld [smem:[#allocation20_spill]]  ;;  %s2131_s15 = smov [#allocation3]  }
  0x12   : > { %p2236_p8 = pnand %p1486_p5, %p220_p7  ;;  %s233_s16 = sshll.u32 %s2131_s15, 4  ;;  %s234_s16 = int_to_ptr.vmem [resolvable:$true] %s233_s16 }
  0x13   : > { %p1491_p11 = scmp.ge.s32.totalorder %s2129_s29, 2  ;;  %s2516_s1 = sld [smem:[#allocation21_spill]] }
  0x14   : > { %p1788_p9 = pneg %p2236_p8  ;;  %s2132_s21 = smov 64  }
  0x15   : > { %s2133_s22 = smov 4   ;;  %s2134_s23 = smov [#allocation6]  }
  0x16   : > { %p2244_p10 = pnand %p1788_p9, %p100_p1  ;;  %s247_s8 = sshll.u32 %s2134_s23, 4  ;;  %s248_s8 = int_to_ptr.vmem [resolvable:$true] %s247_s8 }
  0x17   : > { %s231_s13 = sshll.u32 %s2513_s0, 4  ;;  %s2517_s3 = sld [smem:[#allocation22_spill]]  ;;  %s232_s13 = int_to_ptr.hbm [resolvable:$true] %s231_s13 }
  0x18   : > { %1791 = dma.hbm_to_vmem [thread:$0]  (!%p2244_p10), %s232_s13, 2048, %s234_s16, [#allocation4], %s2132_s21, %s2132_s21, %s2133_s22  }
  0x19   : > { %s245_s20 = sshll.u32 %s2516_s1, 4  ;;  %s2135_s18 = smov [#allocation9]   ;;  %s246_s20 = int_to_ptr.hbm [resolvable:$true] %s245_s20 }
  0x1a   : > { %1794 = dma.hbm_to_vmem [thread:$0]  (!%p2244_p10), %s246_s20, 2048, %s248_s8, [#allocation7], %s2132_s21, %s2132_s21, %s2133_s22  }
  0x1b   : > { %s261_s19 = sshll.u32 %s2135_s18, 4  ;;  %s2518_s5 = sld [smem:[#allocation23_spill]]  ;;  %s262_s19 = int_to_ptr.vmem [resolvable:$true] %s261_s19 }
  0x1c   : > { %s2136_s11 = smov 128   ;;  %s2137_s12 = smov 8  }
  0x1d   : > { %s259_s15 = sshll.u32 %s2517_s3, 4  ;;  %s2138_s20 = smov [#allocation10]   ;;  %s260_s15 = int_to_ptr.hbm [resolvable:$true] %s259_s15 }
  0x1e   : > { %1797 = dma.hbm_to_vmem [thread:$0]  (!%p2244_p10), %s260_s15, 2048, %s262_s19, [#allocation7], %s2136_s11, %s2136_s11, %s2137_s12  }
  0x1f   : > { %s278_s21 = sshll.u32 %s2138_s20, 4  ;;  %s35_s22 = sadd.s32 1, %s2125_s28  ;;  %s279_s21 = int_to_ptr.vmem [resolvable:$true] %s278_s21 }
  0x20   : > { %s86_s8 = sadd.s32 1, %s2117_s26  ;;  %p37_p12 = scmp.ge.s32.totalorder %s35_s22, 2 }
  0x21   : > { %s276_s23 = sshll.u32 %s2518_s5, 4  ;;  %p93_p13 = scmp.ne.s32.totalorder %s2117_s26, %s2113_s25  ;;  %s277_s23 = int_to_ptr.hbm [resolvable:$true] %s276_s23 }
  0x22   : > { %1800 = dma.hbm_to_vmem [thread:$0]  (!%p2244_p10), %s277_s23, 2048, %s279_s21, [#allocation11], %s2136_s11, %s2136_s11, %s2137_s12  }
  0x23   : > { %p94_p0 = scmp.eq.s32.totalorder %s2129_s29, 0  ;;  %p1813_p3 = scmp.lt.s32.totalorder %s2129_s29, 2 }
  0x24   : > { %s2529_s22 = smov (%p37_p12, %s35_s22), 0  ;;  %p2280_p7 = por %p207_p2, %p93_p13 }
  0x25   : > { %2519 = sst [smem:[#allocation19_spill]] %s2529_s22  ;;  %p2274_p5 = por %p94_p0, %p93_p13 }
  0x26   : > { %s81_s18 = ssub.s32 %s2125_s28, %s2529_s22  ;;  %s295_s19 = sand.u32 1, %s2129_s29  }
  0x27   : > { %p84_p9 = scmp.eq.s32.totalorder %s81_s18, 0  ;;  %s297_s13 = sand.u32 1, %s2117_s26  }
  0x28   : > { %s1640_s16 = sshll.u32 %s2125_s28, 6  ;;  %s1492_s11 = sshll.u32 %s297_s13, 6 }
  0x29   : > { %s2290_s23 = scalar_select %p84_p9, %s2117_s26, %s86_s8  }
  0x2a   : > { %s307_s21 = scalar_lea.hbm %s2500_s2, %s1640_s16  ;;  %s299_s1 = scalar_lea.vmem [#allocation8], %s1492_s11 }
  0x2b   : > { %s308_s0 = sshll.u32 %s307_s21, 4  ;;  %s310_s3 = sshll.u32 %s299_s1, 4  ;;  %s309_s0 = int_to_ptr.hbm [resolvable:$true] %s308_s0  ;;  %s311_s3 = int_to_ptr.vmem [resolvable:$true] %s310_s3 }
  0x2c   : > { %p1802_p2 = pnand %p1813_p3, %p2274_p5  ;;  %s296_s5 = scalar_lea.sflag [#allocation4], %s295_s19 }
  0x2d   : > { %s2139_s22 = smov 256   ;;  %s2140_s18 = smov 16  }
  0x2e   : > { %1804 = dma.hbm_to_vmem [thread:$0]  (!%p1802_p2), %s309_s0, 1024, %s311_s3, %s296_s5, %s2139_s22, %s2139_s22, %s2140_s18  }
  0x2f   : > { %322 = sbr.rel (%p2236_p8) target bundleno = 681 (0x2a9), region = 48 }
  0x34   : > { %2084 = dma.done.wait (%p100_p1), [#allocation4], 2048  }
  0x35   : > { %2086 = vsyncadd (%p100_p1), [#allocation4], 4294965248 }
  0x36   : > { %2088 = dma.done.wait (%p100_p1), [#allocation7], 2048  }
  0x37   : > { %2090 = vsyncadd (%p100_p1), [#allocation7], 4294965248  ;;  %s334_s1 = sand.u32 1, %s2214_s30   ;;  %s2311_s0 = sand.u32 1, %s2113_s25  }
  0x38   : > { %s1499_s3 = sshll.u32 %s2311_s0, 6  ;;  %s335_s5 = scalar_lea.sflag [#allocation4], %s334_s1 }
  0x39   : > { %s2314_s14 = scalar_lea.vmem [#allocation8], %s1499_s3 }
  0x3a   : > { %2092 = dma.done.wait (%p2223_p4), %s335_s5, 1024  }
  0x3b   : > { %2094 = vsyncadd (%p2223_p4), %s335_s5, 4294966272 }
  0x3c   : > { %2096 = dma.done.wait (%p100_p1), [#allocation7], 2048  }
  0x3d   : > { %2098 = vsyncadd (%p100_p1), [#allocation7], 4294965248 }
  0x3e   : > { %2100 = dma.done.wait (%p100_p1), [#allocation11], 2048  }
  0x3f   : > { %2102 = vsyncadd (%p100_p1), [#allocation11], 4294965248  ;;  %v1664_v0 = vld [vmem:[#allocation6 + $0x38] sm:$0xff]  ;;  %v1663_v2 = vld [vmem:[#allocation6 + $0x30] sm:$0xff]  ;;  %s1631_s30 = sshll.u32 %s2121_s27, 7  ;;  %s1502_s12 = sshll.u32 %s2311_s0, 7 }
  0x40   : > { %v1672_v1 = vld [vmem:[#allocation6 + $0x78] sm:$0xff]  ;;  %1752 = vmatpush.bf16.msra.mxu2 %v1664_v0  ;;  %v1671_v3 = vld [vmem:[#allocation6 + $0x70] sm:$0xff]  ;;  %674 = vmatpush.bf16.msra.mxu0 %v1664_v0  ;;  %v1662_v4 = vld [vmem:[#allocation6 + $0x28] sm:$0xff]  ;;  %s1002_s9 = sshra.s32 %s1631_s30, 3  ;;  %s2425_s20 = scalar_lea.vmem [#allocation12], %s1502_s12 }
  0x41   : > { %1760 = vmatpush.bf16.msra.mxu3 %v1672_v1  ;;  %723 = vmatpush.bf16.msra.mxu1 %v1672_v1  ;;  %v1670_v5 = vld [vmem:[#allocation6 + $0x68] sm:$0xff]  ;;  %v1661_v6 = vld [vmem:[#allocation6 + $0x20] sm:$0xff]  ;;  %v1660_v8 = vld [vmem:[#allocation6 + $0x18] sm:$0xff]  ;;  %s1632_s22 = sshll.u32 %s1002_s9, 2  ;;  %s1350_s1 = scalar_lea.hbm %s2505_s7, %s1631_s30 }
  0x42   : > { %v1669_v7 = vld [vmem:[#allocation6 + $0x60] sm:$0xff]  ;;  %v1668_v9 = vld [vmem:[#allocation6 + $0x58] sm:$0xff]  ;;  %v1659_v10 = vld [vmem:[#allocation6 + $0x10] sm:$0xff]  ;;  %s2387_s8 = scalar_lea.vmem [#allocation3], %s1632_s22  ;;  %s2390_s15 = scalar_lea.vmem [#allocation6], %s1632_s22 }
  0x43   : > { %v1667_v11 = vld [vmem:[#allocation6 + $0x50] sm:$0xff]  ;;  %v407_v12 = vld [vmem:[%s2314_s14 + $0x20] sm:$0xff]  ;;  %v408_v13 = vld [vmem:[%s2314_s14 + $0x28] sm:$0xff]  ;;  %s1353_s3 = sshll.u32 %s1350_s1, 4  ;;  %s1351_s5 = sshll.u32 %s2425_s20, 4  ;;  %s1354_s3 = int_to_ptr.hbm [resolvable:$true] %s1353_s3  ;;  %s1352_s5 = int_to_ptr.vmem [resolvable:$true] %s1351_s5 }
  0x44   : > { %1753 = vmatpush.bf16.msra.mxu2 %v1663_v2  ;;  %675 = vmatpush.bf16.msra.mxu0 %v1663_v2  ;;  %v427_v14 = vunpack.c.0.s8 %v407_v12  ;;  %v429_v15 = vunpack.c.1.s8 %v407_v12  ;;  %v428_v16 = vunpack.c.0.s8 %v408_v13  ;;  %v430_v17 = vunpack.c.1.s8 %v408_v13  ;;  %v1658_v18 = vld [vmem:[#allocation6 + $0x8] sm:$0xff]  ;;  %v1657_v24 = vld [vmem:[#allocation6] sm:$0xff]  ;;  %v1648_v26 = vld [vmem:[#allocation3 + $0x38] sm:$0xff]  ;;  %s2045_s9 = sshra.s32 %s1354_s3, 4  ;;  %s2046_s9 = int_to_ptr.hbm [resolvable:$true] %s2045_s9 }
  0x45   : > { %1761 = vmatpush.bf16.msra.mxu3 %v1671_v3  ;;  %724 = vmatpush.bf16.msra.mxu1 %v1671_v3  ;;  %v1666_v19 = vld [vmem:[#allocation6 + $0x48] sm:$0xff]  ;;  %v1665_v25 = vld [vmem:[#allocation6 + $0x40] sm:$0xff]  ;;  %v1656_v27 = vld [vmem:[#allocation3 + $0x78] sm:$0xff]  ;;  %v431_v34 = vunpack.c.2.s8 %v407_v12  ;;  %v433_v35 = vunpack.c.3.s8 %v407_v12  ;;  %v432_v36 = vunpack.c.2.s8 %v408_v13  ;;  %v434_v37 = vunpack.c.3.s8 %v408_v13  ;;  %s2047_s27 = scalar_lea.hbm %s2046_s9, 128  ;;  %p2052_p10 = scmp.lt.s32.totalorder %s2046_s9, %s2505_s7 }
  0x46   : > { %v459_v20 = vcvt.s32.f32 %v427_v14  ;;  %v461_v21 = vcvt.s32.f32 %v429_v15  ;;  %v460_v22 = vcvt.s32.f32 %v428_v16  ;;  %v462_v23 = vcvt.s32.f32 %v430_v17  ;;  %v1647_v30 = vld [vmem:[#allocation3 + $0x30] sm:$0xff]  ;;  %v1646_v32 = vld [vmem:[#allocation3 + $0x28] sm:$0xff]  ;;  %v1645_v38 = vld [vmem:[#allocation3 + $0x20] sm:$0xff]  ;;  %p2048_p1 = scmp.ne.s32.totalorder %s2046_s9, %s2047_s27 }
  0x47   : > { %v1655_v31 = vld [vmem:[#allocation3 + $0x70] sm:$0xff]  ;;  %v1654_v33 = vld [vmem:[#allocation3 + $0x68] sm:$0xff]  ;;  %v1653_v39 = vld [vmem:[#allocation3 + $0x60] sm:$0xff]  ;;  %v463_v40 = vcvt.s32.f32 %v431_v34  ;;  %v465_v41 = vcvt.s32.f32 %v433_v35  ;;  %v464_v42 = vcvt.s32.f32 %v432_v36  ;;  %v466_v43 = vcvt.s32.f32 %v434_v37 }
  0x48   : > { %1754 = vmatpush.bf16.msra.mxu2 %v1662_v4  ;;  %676 = vmatpush.bf16.msra.mxu0 %v1662_v4  ;;  %v2330_v28 = vpack.c.bf16 %v461_v21, %v459_v20  ;;  %v2332_v29 = vpack.c.bf16 %v462_v23, %v460_v22  ;;  %v1644_v44 = vld [vmem:[#allocation3 + $0x18] sm:$0xff]  ;;  %v1643_v48 = vld [vmem:[#allocation3 + $0x10] sm:$0xff]  ;;  %v403_v52 = vld [vmem:[%s2314_s14] sm:$0xff]  ;;  %p2049_p4 = pnand %p2048_p1, %p2280_p7 }
  0x49   : > { %1762 = vmatpush.bf16.msra.mxu3 %v1670_v5  ;;  %725 = vmatpush.bf16.msra.mxu1 %v1670_v5  ;;  %v1652_v45 = vld [vmem:[#allocation3 + $0x58] sm:$0xff]  ;;  %v2336_v46 = vpack.c.bf16 %v465_v41, %v463_v40  ;;  %v2338_v47 = vpack.c.bf16 %v466_v43, %v464_v42  ;;  %v1651_v49 = vld [vmem:[#allocation3 + $0x50] sm:$0xff]  ;;  %v404_v53 = vld [vmem:[%s2314_s14 + $0x8] sm:$0xff]  ;;  %v411_v56 = vunpack.c.0.s8 %v403_v52  ;;  %v413_v57 = vunpack.c.1.s8 %v403_v52 }
  0x4a   : > { %v409_v50 = vld [vmem:[%s2314_s14 + $0x30] sm:$0xff]  ;;  %v410_v51 = vld [vmem:[%s2314_s14 + $0x38] sm:$0xff]  ;;  %v1642_v54 = vld [vmem:[#allocation3 + $0x8] sm:$0xff]  ;;  %v412_v58 = vunpack.c.0.s8 %v404_v53  ;;  %v414_v59 = vunpack.c.1.s8 %v404_v53  ;;  %v415_v14 = vunpack.c.2.s8 %v403_v52  ;;  %v417_v15 = vunpack.c.3.s8 %v403_v52  ;;  %p2050_p8 = pneg %p2049_p4 }
  0x4b   : > { %v1650_v55 = vld [vmem:[#allocation3 + $0x48] sm:$0xff]  ;;  %v435_v60 = vunpack.c.0.s8 %v409_v50  ;;  %v437_v61 = vunpack.c.1.s8 %v409_v50  ;;  %v436_v62 = vunpack.c.0.s8 %v410_v51  ;;  %v438_v63 = vunpack.c.1.s8 %v410_v51  ;;  %v1641_v4 = vld [vmem:[#allocation3] sm:$0xff]  ;;  %v405_v36 = vld [vmem:[%s2314_s14 + $0x10] sm:$0xff] }
  0x4c   : > { %1755 = vmatpush.bf16.msra.mxu2 %v1661_v6  ;;  %677 = vmatpush.bf16.msra.mxu0 %v1661_v6  ;;  %v443_v0 = vcvt.s32.f32 %v411_v56  ;;  %v445_v1 = vcvt.s32.f32 %v413_v57  ;;  %v444_v2 = vcvt.s32.f32 %v412_v58  ;;  %v446_v3 = vcvt.s32.f32 %v414_v59  ;;  %v1649_v5 = vld [vmem:[#allocation3 + $0x40] sm:$0xff]  ;;  %v406_v37 = vld [vmem:[%s2314_s14 + $0x18] sm:$0xff]  ;;  %s1339_s14 = scalar_lea.sflag [#allocation5], %s2311_s0 }
  0x4d   : > { %1763 = vmatpush.bf16.msra.mxu3 %v1669_v7  ;;  %726 = vmatpush.bf16.msra.mxu1 %v1669_v7  ;;  %v416_v16 = vunpack.c.2.s8 %v404_v53  ;;  %v418_v17 = vunpack.c.3.s8 %v404_v53  ;;  %v439_v22 = vunpack.c.2.s8 %v409_v50  ;;  %v441_v23 = vunpack.c.3.s8 %v409_v50 }
  0x4e   : > { %v475_v6 = vpack.c.bf16 %v445_v1, %v443_v0  ;;  %v476_v7 = vpack.c.bf16 %v446_v3, %v444_v2  ;;  %v420_v40 = vunpack.c.0.s8 %v406_v37  ;;  %v422_v41 = vunpack.c.1.s8 %v406_v37  ;;  %v1131_v0 = vld [vmem:[#allocation9 + $0x58] sm:$0xff]  ;;  %v1130_v1 = vld [vmem:[#allocation9 + $0x50] sm:$0xff]  ;;  %v1129_v2 = vld [vmem:[#allocation9 + $0x48] sm:$0xff] }
  0x4f   : > { %v448_v20 = vcvt.s32.f32 %v416_v16  ;;  %v450_v21 = vcvt.s32.f32 %v418_v17  ;;  %v423_v50 = vunpack.c.2.s8 %v405_v36  ;;  %v424_v52 = vunpack.c.2.s8 %v406_v37  ;;  %v1124_v16 = vld [vmem:[#allocation9 + $0x20] sm:$0xff]  ;;  %v1123_v17 = vld [vmem:[#allocation9 + $0x18] sm:$0xff] }
  0x50   : > { %1756 = vmatpush.bf16.msra.mxu2 %v1660_v8  ;;  %678 = vmatpush.bf16.msra.mxu0 %v1660_v8  ;;  %v467_v8 = vcvt.s32.f32 %v435_v60  ;;  %v426_v53 = vunpack.c.3.s8 %v406_v37  ;;  %v1135_v60 = vld [vmem:[#allocation9 + $0x78] sm:$0xff] }
  0x51   : > { %1764 = vmatpush.bf16.msra.mxu3 %v1668_v9  ;;  %727 = vmatpush.bf16.msra.mxu1 %v1668_v9  ;;  %v469_v9 = vcvt.s32.f32 %v437_v61  ;;  %v456_v56 = vcvt.s32.f32 %v424_v52  ;;  %v1134_v61 = vld [vmem:[#allocation9 + $0x70] sm:$0xff] }
  0x52   : > { %v458_v57 = vcvt.s32.f32 %v426_v53 }
  0x53   : > { %v2346_v12 = vpack.c.bf16 %v469_v9, %v467_v8 }
  0x54   : > { %1757 = vmatpush.bf16.msra.mxu2 %v1659_v10  ;;  %679 = vmatpush.bf16.msra.mxu0 %v1659_v10  ;;  %v468_v10 = vcvt.s32.f32 %v436_v62  ;;  %v482_v59 = vpack.c.bf16 %v458_v57, %v456_v56  ;;  %v1133_v62 = vld [vmem:[#allocation9 + $0x68] sm:$0xff] }
  0x55   : > { %1765 = vmatpush.bf16.msra.mxu3 %v1667_v11  ;;  %728 = vmatpush.bf16.msra.mxu1 %v1667_v11  ;;  %v470_v11 = vcvt.s32.f32 %v438_v63  ;;  %v1132_v63 = vld [vmem:[#allocation9 + $0x60] sm:$0xff] }
  0x57   : > { %v2348_v13 = vpack.c.bf16 %v470_v11, %v468_v10  ;;  %v1126_v11 = vld [vmem:[#allocation9 + $0x30] sm:$0xff] }
  0x58   : > { %1758 = vmatpush.bf16.msra.mxu2 %v1658_v18  ;;  %680 = vmatpush.bf16.msra.mxu0 %v1658_v18  ;;  %v447_v18 = vcvt.s32.f32 %v415_v14 }
  0x59   : > { %1766 = vmatpush.bf16.msra.mxu3 %v1666_v19  ;;  %729 = vmatpush.bf16.msra.mxu1 %v1666_v19  ;;  %v449_v19 = vcvt.s32.f32 %v417_v15 }
  0x5c   : > { %1759 = vmatpush.bf16.msra.mxu2 %v1657_v24  ;;  %681 = vmatpush.bf16.msra.mxu0 %v1657_v24  ;;  %v440_v24 = vunpack.c.2.s8 %v410_v51 }
  0x5d   : > { %1767 = vmatpush.bf16.msra.mxu3 %v1665_v25  ;;  %730 = vmatpush.bf16.msra.mxu1 %v1665_v25  ;;  %v442_v25 = vunpack.c.3.s8 %v410_v51  ;;  %v425_v51 = vunpack.c.3.s8 %v405_v36 }
  0x5f   : > { %702 = vmatmul.bf16.vlgmr.msra.gmra.mxu2 %v2330_v28  ;;  %682 = vmatmul.bf16.vlgmr.msra.gmra.mxu0 %v475_v6 }
  0x60   : > { %868 = vmatpush.bf16.msrb.mxu2 %v1648_v26  ;;  %751 = vmatmul.bf16.vlgmr.msra.gmra.mxu3 %v2332_v29  ;;  %v477_v26 = vpack.c.bf16 %v449_v19, %v447_v18 }
  0x61   : > { %917 = vmatpush.bf16.msrb.mxu3 %v1656_v27  ;;  %731 = vmatmul.bf16.vlgmr.msra.gmra.mxu1 %v476_v7  ;;  %v478_v27 = vpack.c.bf16 %v450_v21, %v448_v20  ;;  %v1122_v21 = vld [vmem:[#allocation9 + $0x10] sm:$0xff] }
  0x62   : > { %1140 = vmatpush.msrb.mxu0 %v1135_v60  ;;  %v1738_v60 = vld [vmem:[%s2387_s8 + $0x8] sm:$0xff]  }
  0x64   : > { %869 = vmatpush.bf16.msrb.mxu2 %v1647_v30  ;;  %v471_v30 = vcvt.s32.f32 %v439_v22  ;;  %1141 = vmatpush.msrb.mxu0 %v1134_v61  ;;  %v1121_v22 = vld [vmem:[#allocation9 + $0x8] sm:$0xff] }
  0x65   : > { %918 = vmatpush.bf16.msrb.mxu3 %v1655_v31  ;;  %v473_v31 = vcvt.s32.f32 %v441_v23  ;;  %v1745_v61 = vld [vmem:[%s2390_s15 + $0x8] sm:$0xff]  }
  0x66   : > { %1142 = vmatpush.msrb.mxu0 %v1133_v62 }
  0x67   : > { %v2352_v34 = vpack.c.bf16 %v473_v31, %v471_v30 }
  0x68   : > { %870 = vmatpush.bf16.msrb.mxu2 %v1646_v32  ;;  %v472_v32 = vcvt.s32.f32 %v440_v24  ;;  %1143 = vmatpush.msrb.mxu0 %v1132_v63  ;;  %v1120_v24 = vld [vmem:[#allocation9] sm:$0xff] }
  0x69   : > { %919 = vmatpush.bf16.msrb.mxu3 %v1654_v33  ;;  %v474_v33 = vcvt.s32.f32 %v442_v25 }
  0x6a   : > { %1144 = vmatpush.msrb.mxu0 %v1131_v0 }
  0x6b   : > { %v2354_v35 = vpack.c.bf16 %v474_v33, %v472_v32 }
  0x6c   : > { %871 = vmatpush.bf16.msrb.mxu2 %v1645_v38  ;;  %v419_v38 = vunpack.c.0.s8 %v405_v36  ;;  %1145 = vmatpush.msrb.mxu0 %v1130_v1 }
  0x6d   : > { %920 = vmatpush.bf16.msrb.mxu3 %v1653_v39  ;;  %v421_v39 = vunpack.c.1.s8 %v405_v36 }
  0x6e   : > { %v451_v42 = vcvt.s32.f32 %v419_v38  ;;  %1146 = vmatpush.msrb.mxu0 %v1129_v2 }
  0x6f   : > { %707 = vmatmul.bf16.gmra.mxu2 %v2336_v46  ;;  %687 = vmatmul.bf16.gmra.mxu0 %v477_v26  ;;  %v453_v43 = vcvt.s32.f32 %v421_v39 }
  0x70   : > { %872 = vmatpush.bf16.msrb.mxu2 %v1644_v44  ;;  %756 = vmatmul.bf16.gmra.mxu3 %v2338_v47  ;;  %v452_v44 = vcvt.s32.f32 %v420_v40 }
  0x71   : > { %921 = vmatpush.bf16.msrb.mxu3 %v1652_v45  ;;  %736 = vmatmul.bf16.gmra.mxu1 %v478_v27  ;;  %v454_v45 = vcvt.s32.f32 %v422_v41 }
  0x74   : > { %873 = vmatpush.bf16.msrb.mxu2 %v1643_v48  ;;  %v479_v48 = vpack.c.bf16 %v453_v43, %v451_v42 }
  0x75   : > { %922 = vmatpush.bf16.msrb.mxu3 %v1651_v49  ;;  %v480_v49 = vpack.c.bf16 %v454_v45, %v452_v44 }
  0x78   : > { %874 = vmatpush.bf16.msrb.mxu2 %v1642_v54  ;;  %v455_v54 = vcvt.s32.f32 %v423_v50 }
  0x79   : > { %923 = vmatpush.bf16.msrb.mxu3 %v1650_v55  ;;  %v457_v55 = vcvt.s32.f32 %v425_v51 }
  0x7b   : > { %v481_v58 = vpack.c.bf16 %v457_v55, %v455_v54 }
  0x7c   : > { %875 = vmatpush.bf16.msrb.mxu2 %v1641_v4 }
  0x7d   : > { %924 = vmatpush.bf16.msrb.mxu3 %v1649_v5 }
  0x7f   : > { %712 = vmatmul.bf16.gmra.mxu2 %v2346_v12  ;;  %692 = vmatmul.bf16.gmra.mxu0 %v479_v48 }
  0x80   : > { %761 = vmatmul.bf16.gmra.mxu3 %v2348_v13 }
  0x81   : > { %741 = vmatmul.bf16.gmra.mxu1 %v480_v49 }
  0x8f   : > { %717 = vmatmul.bf16.gmra.mxu2 %v2352_v34  ;;  %697 = vmatmul.bf16.gmra.mxu0 %v481_v58 }
  0x90   : > { %766 = vmatmul.bf16.gmra.mxu3 %v2354_v35 }
  0x91   : > { %746 = vmatmul.bf16.gmra.mxu1 %v482_v59 }
  0x9f   : > { %876 = vmatmul.bf16.vlgmr.msrb.gmra.mxu2 %v475_v6  ;;  %v1128_v6 = vld [vmem:[#allocation9 + $0x40] sm:$0xff] }
  0xa0   : > { %925 = vmatmul.bf16.vlgmr.msrb.gmra.mxu3 %v476_v7  ;;  %v1127_v7 = vld [vmem:[#allocation9 + $0x38] sm:$0xff]  ;;  %1147 = vmatpush.msrb.mxu0 %v1128_v6 }
  0xa2   : > { %1148 = vmatpush.msrb.mxu0 %v1127_v7 }
  0xa4   : > { %1149 = vmatpush.msrb.mxu0 %v1126_v11 }
  0xaf   : > { %881 = vmatmul.bf16.gmra.mxu2 %v477_v26 }
  0xb0   : > { %930 = vmatmul.bf16.gmra.mxu3 %v478_v27 }
  0xbf   : > { %886 = vmatmul.bf16.gmra.mxu2 %v479_v48 }
  0xc0   : > { %935 = vmatmul.bf16.gmra.mxu3 %v480_v49 }
  0xcf   : > { %891 = vmatmul.bf16.gmra.mxu2 %v481_v58 }
  0xd0   : > { %940 = vmatmul.bf16.gmra.mxu3 %v482_v59 }
  0xdc   : > { %v683_v30 = vpop.f32.mrf.mxu0 }
  0xde   : > { %v732_v31 = vpop.f32.mrf.mxu1 }
  0xdf   : > { %896 = vmatmul.bf16.gmra.mxu2 %v2330_v28  ;;  %v1125_v28 = vld [vmem:[#allocation9 + $0x28] sm:$0xff]  ;;  %v733_v40 = vadd.f32 %v732_v31, %v683_v30 }
  0xe0   : > { %945 = vmatmul.bf16.gmra.mxu3 %v2332_v29  ;;  %1150 = vmatpush.msrb.mxu0 %v1125_v28 }
  0xe2   : > { %v703_v3 = vpop.f32.mrf.mxu2  ;;  %1151 = vmatpush.msrb.mxu0 %v1124_v16  ;;  %v1681_v16 = vunpack.c.h.bf16 %v1738_v60 }
  0xe3   : > { %v752_v4 = vpop.f32.mrf.mxu3 }
  0xe4   : > { %v2362_v5 = vadd.f32 %v752_v4, %v703_v3  ;;  %1152 = vmatpush.msrb.mxu0 %v1123_v17  ;;  %v685_v33 = vpop.f32.mrf.mxu0  ;;  %v1680_v3 = vunpack.c.l.bf16 %v1738_v60  ;;  %v1712_v4 = vunpack.c.l.bf16 %v1745_v61  ;;  %v1713_v17 = vunpack.c.h.bf16 %v1745_v61 }
  0xe6   : > { %1153 = vmatpush.msrb.mxu0 %v1122_v21  ;;  %v734_v36 = vpop.f32.mrf.mxu1 }
  0xe7   : > { %v735_v55 = vadd.f32 %v734_v36, %v685_v33 }
  0xe8   : > { %1154 = vmatpush.msrb.mxu0 %v1121_v22 }
  0xea   : > { %v705_v8 = vpop.f32.mrf.mxu2  ;;  %1155 = vmatpush.msrb.mxu0 %v1120_v24  ;;  %v1746_v24 = vld [vmem:[%s2390_s15 + $0x10] sm:$0xff]  }
  0xeb   : > { %v754_v9 = vpop.f32.mrf.mxu3 }
  0xec   : > { %v2364_v10 = vadd.f32 %v754_v9, %v705_v8  ;;  %v688_v49 = vpop.f32.mrf.mxu0  ;;  %v1074_v9 = vadd.f32 %v1712_v4, %v1680_v3  ;;  %v1233_v3 = vld [vmem:[#allocation10 + $0x60] sm:$0xff] }
  0xee   : > { %v737_v50 = vpop.f32.mrf.mxu1 }
  0xef   : > { %901 = vmatmul.bf16.gmra.mxu2 %v2336_v46  ;;  %v738_v1 = vadd.f32 %v737_v50, %v688_v49 }
  0xf0   : > { %950 = vmatmul.bf16.gmra.mxu3 %v2338_v47 }
  0xf2   : > { %v708_v29 = vpop.f32.mrf.mxu2 }
  0xf3   : > { %v757_v14 = vpop.f32.mrf.mxu3 }
  0xf4   : > { %v2368_v15 = vadd.f32 %v757_v14, %v708_v29  ;;  %v690_v63 = vpop.f32.mrf.mxu0 }
  0xf6   : > { %v739_v0 = vpop.f32.mrf.mxu1 }
  0xfa   : > { %v710_v18 = vpop.f32.mrf.mxu2 }
  0xfb   : > { %v759_v19 = vpop.f32.mrf.mxu3 }
  0xfc   : > { %v2370_v20 = vadd.f32 %v759_v19, %v710_v18  ;;  %v693_v28 = vpop.f32.mrf.mxu0  ;;  %v740_v18 = vadd.f32 %v739_v0, %v690_v63 }
  0xfe   : > { %v742_v29 = vpop.f32.mrf.mxu1 }
  0xff   : > { %906 = vmatmul.bf16.gmra.mxu2 %v2346_v12 }
 0x100   : > { %955 = vmatmul.bf16.gmra.mxu3 %v2348_v13 }
 0x102   : > { %v713_v46 = vpop.f32.mrf.mxu2 }
 0x103   : > { %v762_v47 = vpop.f32.mrf.mxu3 }
 0x104   : > { %v2374_v23 = vadd.f32 %v762_v47, %v713_v46  ;;  %v1075_v46 = vadd.f32 %v1713_v17, %v1681_v16  ;;  %v1739_v47 = vld [vmem:[%s2387_s8 + $0x10] sm:$0xff]   ;;  %v1741_v17 = vld [vmem:[%s2387_s8 + $0x20] sm:$0xff]  }
 0x105   : > { %v1684_v31 = vunpack.c.l.bf16 %v1739_v47 }
 0x106   : > { %v744_v33 = vpop.f32.mrf.mxu1 }
 0x10a   : > { %v715_v25 = vpop.f32.mrf.mxu2 }
 0x10b   : > { %v764_v26 = vpop.f32.mrf.mxu3 }
 0x10c   : > { %v2376_v27 = vadd.f32 %v764_v26, %v715_v25  ;;  %v743_v26 = vadd.f32 %v742_v29, %v693_v28 }
 0x10f   : > { %911 = vmatmul.bf16.gmra.mxu2 %v2352_v34  ;;  %v1675_v34 = vld [vmem:[%s2387_s8] sm:$0xff]  }
 0x110   : > { %960 = vmatmul.bf16.gmra.mxu3 %v2354_v35  ;;  %v1707_v35 = vld [vmem:[%s2390_s15] sm:$0xff]   ;;  %v1676_v41 = vunpack.c.l.bf16 %v1675_v34  ;;  %v1677_v53 = vunpack.c.h.bf16 %v1675_v34 }
 0x111   : > { %v1708_v42 = vunpack.c.l.bf16 %v1707_v35  ;;  %v1709_v54 = vunpack.c.h.bf16 %v1707_v35 }
 0x112   : > { %v718_v12 = vpop.f32.mrf.mxu2 }
 0x113   : > { %v767_v13 = vpop.f32.mrf.mxu3  ;;  %v1072_v48 = vadd.f32 %v1708_v42, %v1676_v41  ;;  %v1073_v59 = vadd.f32 %v1709_v54, %v1677_v53  ;;  %v1685_v41 = vunpack.c.h.bf16 %v1739_v47  ;;  %v1717_v42 = vunpack.c.h.bf16 %v1746_v24  ;;  %v1747_v53 = vld [vmem:[%s2390_s15 + $0x18] sm:$0xff]  }
 0x114   : > { %v2381_v32 = vadd.f32 %v767_v13, %v718_v12  ;;  %v1716_v12 = vunpack.c.l.bf16 %v1746_v24  ;;  %v695_v13 = vpop.f32.mrf.mxu0  ;;  %v1720_v60 = vunpack.c.l.bf16 %v1747_v53  ;;  %v1692_v47 = vunpack.c.l.bf16 %v1741_v17 }
 0x115   : > { %v1077_v49 = vadd.f32 %v1717_v42, %v1685_v41  ;;  %v1742_v42 = vld [vmem:[%s2387_s8 + $0x28] sm:$0xff]  }
 0x116   : > { %v1076_v34 = vadd.f32 %v1716_v12, %v1684_v31 }
 0x11a   : > { %v720_v37 = vpop.f32.mrf.mxu2 }
 0x11b   : > { %v769_v38 = vpop.f32.mrf.mxu3 }
 0x11c   : > { %v2385_v39 = vadd.f32 %v769_v38, %v720_v37  ;;  %v698_v50 = vpop.f32.mrf.mxu0 }
 0x122   : > { %v877_v43 = vpop.f32.mrf.mxu2 }
 0x123   : > { %v926_v44 = vpop.f32.mrf.mxu3  ;;  %v878_v45 = vadd.f32 %v877_v43, %v733_v40  ;;  %v745_v43 = vadd.f32 %v744_v33, %v695_v13  ;;  %v1230_v13 = vld [vmem:[#allocation10 + $0x48] sm:$0xff]  ;;  %v1229_v33 = vld [vmem:[#allocation10 + $0x40] sm:$0xff] }
 0x124   : > { %v700_v4 = vpop.f32.mrf.mxu0 }
 0x125   : > { %v927_v51 = vadd.f32 %v926_v44, %v878_v45 }
 0x127   : > { %v1104_v52 = vadd.f32 %v1072_v48, %v927_v51  ;;  %v747_v51 = vpop.f32.mrf.mxu1 }
 0x129   : > { %1156 = vmatmul.f32.vlgmr.msrb.gmra.mxu0 %v1104_v52  ;;  %v1740_v52 = vld [vmem:[%s2387_s8 + $0x18] sm:$0xff]  }
 0x12a   : > { %v879_v56 = vpop.f32.mrf.mxu2 }
 0x12b   : > { %v928_v57 = vpop.f32.mrf.mxu3  ;;  %v880_v58 = vadd.f32 %v879_v56, %v735_v55  ;;  %v1236_v55 = vld [vmem:[#allocation10 + $0x78] sm:$0xff]  ;;  %v1235_v56 = vld [vmem:[#allocation10 + $0x70] sm:$0xff] }
 0x12c   : > { %1241 = vmatpush.msrb.mxu1 %v1236_v55  ;;  %v1226_v55 = vld [vmem:[#allocation10 + $0x28] sm:$0xff] }
 0x12d   : > { %v929_v62 = vadd.f32 %v928_v57, %v880_v58  ;;  %v748_v57 = vadd.f32 %v747_v51, %v698_v50 }
 0x12e   : > { %1242 = vmatpush.msrb.mxu1 %v1235_v56  ;;  %v1225_v56 = vld [vmem:[#allocation10 + $0x20] sm:$0xff] }
 0x12f   : > { %v1105_v2 = vadd.f32 %v1073_v59, %v929_v62  ;;  %v1688_v59 = vunpack.c.l.bf16 %v1740_v52 }
 0x131   : > { %1159 = vmatmul.f32.gmra.mxu0 %v1105_v2  ;;  %v1078_v0 = vadd.f32 %v1720_v60, %v1688_v59  ;;  %v1234_v2 = vld [vmem:[#allocation10 + $0x68] sm:$0xff] }
 0x132   : > { %v882_v6 = vpop.f32.mrf.mxu2  ;;  %1243 = vmatpush.msrb.mxu1 %v1234_v2 }
 0x133   : > { %v931_v7 = vpop.f32.mrf.mxu3  ;;  %v883_v8 = vadd.f32 %v882_v6, %v738_v1  ;;  %v749_v6 = vpop.f32.mrf.mxu1 }
 0x134   : > { %1244 = vmatpush.msrb.mxu1 %v1233_v3  ;;  %v1223_v3 = vld [vmem:[#allocation10 + $0x10] sm:$0xff] }
 0x135   : > { %v932_v11 = vadd.f32 %v931_v7, %v883_v8  ;;  %v1689_v8 = vunpack.c.h.bf16 %v1740_v52 }
 0x137   : > { %v1106_v14 = vadd.f32 %v1074_v9, %v932_v11  ;;  %v1721_v9 = vunpack.c.h.bf16 %v1747_v53  ;;  %v750_v11 = vadd.f32 %v749_v6, %v700_v4 }
 0x139   : > { %1162 = vmatmul.f32.gmra.mxu0 %v1106_v14  ;;  %v1079_v16 = vadd.f32 %v1721_v9, %v1689_v8  ;;  %v1222_v8 = vld [vmem:[#allocation10 + $0x8] sm:$0xff] }
 0x13a   : > { %v884_v19 = vpop.f32.mrf.mxu2 }
 0x13b   : > { %v933_v21 = vpop.f32.mrf.mxu3  ;;  %v885_v22 = vadd.f32 %v884_v19, %v740_v18  ;;  %v1748_v18 = vld [vmem:[%s2390_s15 + $0x20] sm:$0xff]  }
 0x13c   : > { %v1724_v24 = vunpack.c.l.bf16 %v1748_v18 }
 0x13d   : > { %v934_v25 = vadd.f32 %v933_v21, %v885_v22  ;;  %v1232_v21 = vld [vmem:[#allocation10 + $0x58] sm:$0xff]  ;;  %v1231_v22 = vld [vmem:[#allocation10 + $0x50] sm:$0xff] }
 0x13e   : > { %1245 = vmatpush.msrb.mxu1 %v1232_v21  ;;  %v1080_v31 = vadd.f32 %v1724_v24, %v1692_v47  ;;  %v1744_v47 = vld [vmem:[%s2387_s8 + $0x38] sm:$0xff]  }
 0x13f   : > { %v1107_v30 = vadd.f32 %v1075_v46, %v934_v25  ;;  %v1751_v24 = vld [vmem:[%s2390_s15 + $0x38] sm:$0xff]  }
 0x140   : > { %1246 = vmatpush.msrb.mxu1 %v1231_v22 }
 0x141   : > { %1165 = vmatmul.f32.gmra.mxu0 %v1107_v30 }
 0x142   : > { %v887_v36 = vpop.f32.mrf.mxu2  ;;  %1247 = vmatpush.msrb.mxu1 %v1230_v13 }
 0x143   : > { %v936_v37 = vpop.f32.mrf.mxu3  ;;  %v888_v38 = vadd.f32 %v887_v36, %v743_v26 }
 0x144   : > { %1248 = vmatpush.msrb.mxu1 %v1229_v33 }
 0x145   : > { %v937_v35 = vadd.f32 %v936_v37, %v888_v38  ;;  %v1693_v37 = vunpack.c.h.bf16 %v1741_v17  ;;  %v1725_v38 = vunpack.c.h.bf16 %v1748_v18  ;;  %v1221_v18 = vld [vmem:[#allocation10] sm:$0xff] }
 0x147   : > { %v1108_v40 = vadd.f32 %v1076_v34, %v937_v35  ;;  %v1081_v41 = vadd.f32 %v1725_v38, %v1693_v37  ;;  %v1705_v38 = vunpack.c.h.bf16 %v1744_v47 }
 0x149   : > { %1168 = vmatmul.f32.gmra.mxu0 %v1108_v40 }
 0x14a   : > { %v889_v44 = vpop.f32.mrf.mxu2 }
 0x14b   : > { %v938_v45 = vpop.f32.mrf.mxu3  ;;  %v890_v48 = vadd.f32 %v889_v44, %v745_v43  ;;  %v1749_v43 = vld [vmem:[%s2390_s15 + $0x28] sm:$0xff]  }
 0x14c   : > { %v1728_v50 = vunpack.c.l.bf16 %v1749_v43  ;;  %v1729_v59 = vunpack.c.h.bf16 %v1749_v43 }
 0x14d   : > { %v939_v54 = vadd.f32 %v938_v45, %v890_v48  ;;  %v1227_v45 = vld [vmem:[#allocation10 + $0x30] sm:$0xff] }
 0x14f   : > { %v1109_v58 = vadd.f32 %v1077_v49, %v939_v54  ;;  %v1696_v49 = vunpack.c.l.bf16 %v1742_v42 }
 0x151   : > { %1171 = vmatmul.f32.gmra.mxu0 %v1109_v58  ;;  %v1082_v54 = vadd.f32 %v1728_v50, %v1696_v49  ;;  %v1697_v58 = vunpack.c.h.bf16 %v1742_v42 }
 0x152   : > { %v892_v61 = vpop.f32.mrf.mxu2 }
 0x153   : > { %v941_v62 = vpop.f32.mrf.mxu3  ;;  %v893_v63 = vadd.f32 %v892_v61, %v748_v57 }
 0x155   : > { %v942_v1 = vadd.f32 %v941_v62, %v893_v63  ;;  %v1083_v63 = vadd.f32 %v1729_v59, %v1697_v58 }
 0x157   : > { %v1110_v7 = vadd.f32 %v1078_v0, %v942_v1  ;;  %v1743_v0 = vld [vmem:[%s2387_s8 + $0x30] sm:$0xff]   ;;  %s2051_s8 = scalar_lea.hbm %s2505_s7, 256 }
 0x158   : > { %v1750_v1 = vld [vmem:[%s2390_s15 + $0x30] sm:$0xff]   ;;  %v1700_v6 = vunpack.c.l.bf16 %v1743_v0  ;;  %p2053_p12 = scmp.lt.s32.totalorder %s2051_s8, %s2047_s27 }
 0x159   : > { %1174 = vmatmul.f32.gmra.mxu0 %v1110_v7  ;;  %v1732_v7 = vunpack.c.l.bf16 %v1750_v1  ;;  %v1733_v17 = vunpack.c.h.bf16 %v1750_v1 }
 0x15a   : > { %v894_v28 = vpop.f32.mrf.mxu2  ;;  %p2054_p13 = por %p2053_p12, %p2052_p10 }
 0x15b   : > { %v943_v29 = vpop.f32.mrf.mxu3  ;;  %v895_v14 = vadd.f32 %v894_v28, %v750_v11  ;;  %v1084_v28 = vadd.f32 %v1732_v7, %v1700_v6 }
 0x15c   : > { %p2055_p0 = pnand %p2054_p13, %p2050_p8 }
 0x15d   : > { %v944_v19 = vadd.f32 %v943_v29, %v895_v14 }
 0x15f   : > { %v1111_v46 = vadd.f32 %v1079_v16, %v944_v19  ;;  %v1701_v16 = vunpack.c.h.bf16 %v1743_v0 }
 0x161   : > { %1177 = vmatmul.f32.gmra.mxu0 %v1111_v46  ;;  %v1085_v46 = vadd.f32 %v1733_v17, %v1701_v16 }
 0x162   : > { %v897_v25 = vpop.f32.mrf.mxu2 }
 0x163   : > { %v946_v26 = vpop.f32.mrf.mxu3  ;;  %v898_v30 = vadd.f32 %v897_v25, %v2362_v5  ;;  %v1228_v5 = vld [vmem:[#allocation10 + $0x38] sm:$0xff] }
 0x164   : > { %1249 = vmatpush.msrb.mxu1 %v1228_v5 }
 0x165   : > { %v947_v12 = vadd.f32 %v946_v26, %v898_v30  ;;  %v1704_v30 = vunpack.c.l.bf16 %v1744_v47 }
 0x166   : > { %1250 = vmatpush.msrb.mxu1 %v1227_v45 }
 0x167   : > { %v1112_v36 = vadd.f32 %v1080_v31, %v947_v12  ;;  %v1736_v31 = vunpack.c.l.bf16 %v1751_v24 }
 0x168   : > { %1251 = vmatpush.msrb.mxu1 %v1226_v55 }
 0x169   : > { %1180 = vmatmul.f32.gmra.mxu0 %v1112_v36  ;;  %v1086_v33 = vadd.f32 %v1736_v31, %v1704_v30  ;;  %v2421_v31 = vld [vmem:[%s2504_s6] ss:$0 sm:$0xff] }
 0x16a   : > { %v899_v34 = vpop.f32.mrf.mxu2  ;;  %1252 = vmatpush.msrb.mxu1 %v1225_v56 }
 0x16b   : > { %v948_v35 = vpop.f32.mrf.mxu3  ;;  %v900_v40 = vadd.f32 %v899_v34, %v2364_v10  ;;  %v1737_v34 = vunpack.c.h.bf16 %v1751_v24 }
 0x16d   : > { %v949_v44 = vadd.f32 %v948_v35, %v900_v40  ;;  %v1087_v40 = vadd.f32 %v1737_v34, %v1705_v38 }
 0x16f   : > { %v1113_v48 = vadd.f32 %v1081_v41, %v949_v44  ;;  %v1879_v44 = vld [vmem:[%s2502_s4] ss:$0 sm:$0xff] }
 0x171   : > { %1183 = vmatmul.f32.gmra.mxu0 %v1113_v48 }
 0x172   : > { %v902_v51 = vpop.f32.mrf.mxu2 }
 0x173   : > { %v951_v52 = vpop.f32.mrf.mxu3  ;;  %v903_v53 = vadd.f32 %v902_v51, %v2368_v15  ;;  %v1224_v15 = vld [vmem:[#allocation10 + $0x18] sm:$0xff] }
 0x174   : > { %1253 = vmatpush.msrb.mxu1 %v1224_v15 }
 0x175   : > { %v952_v10 = vadd.f32 %v951_v52, %v903_v53 }
 0x176   : > { %1254 = vmatpush.msrb.mxu1 %v1223_v3 }
 0x177   : > { %v1114_v57 = vadd.f32 %v1082_v54, %v952_v10 }
 0x178   : > { %1255 = vmatpush.msrb.mxu1 %v1222_v8 }
 0x179   : > { %1186 = vmatmul.f32.gmra.mxu0 %v1114_v57 }
 0x17a   : > { %v904_v60 = vpop.f32.mrf.mxu2  ;;  %1256 = vmatpush.msrb.mxu1 %v1221_v18 }
 0x17b   : > { %v953_v61 = vpop.f32.mrf.mxu3  ;;  %v905_v62 = vadd.f32 %v904_v60, %v2370_v20 }
 0x17d   : > { %v954_v2 = vadd.f32 %v953_v61, %v905_v62 }
 0x17f   : > { %v1115_v4 = vadd.f32 %v1083_v63, %v954_v2 }
 0x181   : > { %1189 = vmatmul.f32.gmra.mxu0 %v1115_v4 }
 0x182   : > { %v907_v9 = vpop.f32.mrf.mxu2 }
 0x183   : > { %v956_v11 = vpop.f32.mrf.mxu3  ;;  %v908_v20 = vadd.f32 %v907_v9, %v2374_v23 }
 0x185   : > { %v957_v29 = vadd.f32 %v956_v11, %v908_v20 }
 0x187   : > { %v1116_v14 = vadd.f32 %v1084_v28, %v957_v29 }
 0x189   : > { %1192 = vmatmul.f32.gmra.mxu0 %v1116_v14 }
 0x18a   : > { %v909_v19 = vpop.f32.mrf.mxu2 }
 0x18b   : > { %v958_v21 = vpop.f32.mrf.mxu3  ;;  %v910_v22 = vadd.f32 %v909_v19, %v2376_v27 }
 0x18d   : > { %v959_v25 = vadd.f32 %v958_v21, %v910_v22 }
 0x18f   : > { %v1117_v26 = vadd.f32 %v1085_v46, %v959_v25 }
 0x191   : > { %1195 = vmatmul.f32.gmra.mxu0 %v1117_v26 }
 0x192   : > { %v912_v23 = vpop.f32.mrf.mxu2 }
 0x193   : > { %v961_v12 = vpop.f32.mrf.mxu3  ;;  %v913_v13 = vadd.f32 %v912_v23, %v2381_v32 }
 0x195   : > { %v962_v36 = vadd.f32 %v961_v12, %v913_v13 }
 0x197   : > { %v1118_v37 = vadd.f32 %v1086_v33, %v962_v36 }
 0x199   : > { %1198 = vmatmul.f32.gmra.mxu0 %v1118_v37 }
 0x19a   : > { %v914_v35 = vpop.f32.mrf.mxu2 }
 0x19b   : > { %v915_v27 = vadd.f32 %v914_v35, %v2385_v39  ;;  %v963_v41 = vpop.f32.mrf.mxu3 }
 0x19d   : > { %v964_v42 = vadd.f32 %v963_v41, %v915_v27 }
 0x19f   : > { %v1119_v43 = vadd.f32 %v1087_v40, %v964_v42 }
 0x1a1   : > { %1201 = vmatmul.f32.gmra.mxu0 %v1119_v43 }
 0x1a6   : > { %v1157_v5 = vpop.f32.mrf.mxu0 }
 0x1a7   : > { %v1158_v32 = vadd.f32 %v1879_v44, %v1157_v5 }
 0x1a9   : > { %v1205_v45 = vmax.f32 %v1158_v32, 0.0 }
 0x1ab   : > { %1257 = vmatmul.f32.vlgmr.msrb.gmra.mxu1 %v1205_v45 }
 0x1ae   : > { %v1160_v48 = vpop.f32.mrf.mxu0 }
 0x1af   : > { %v1161_v49 = vadd.f32 %v1879_v44, %v1160_v48 }
 0x1b1   : > { %v1206_v50 = vmax.f32 %v1161_v49, 0.0 }
 0x1b3   : > { %1260 = vmatmul.f32.gmra.mxu1 %v1206_v50 }
 0x1b6   : > { %v1163_v51 = vpop.f32.mrf.mxu0 }
 0x1b7   : > { %v1164_v52 = vadd.f32 %v1879_v44, %v1163_v51 }
 0x1b9   : > { %v1207_v39 = vmax.f32 %v1164_v52, 0.0 }
 0x1bb   : > { %1263 = vmatmul.f32.gmra.mxu1 %v1207_v39 }
 0x1be   : > { %v1166_v53 = vpop.f32.mrf.mxu0 }
 0x1bf   : > { %v1167_v54 = vadd.f32 %v1879_v44, %v1166_v53 }
 0x1c1   : > { %v1208_v10 = vmax.f32 %v1167_v54, 0.0 }
 0x1c3   : > { %1266 = vmatmul.f32.gmra.mxu1 %v1208_v10 }
 0x1c6   : > { %v1169_v55 = vpop.f32.mrf.mxu0 }
 0x1c7   : > { %v1170_v56 = vadd.f32 %v1879_v44, %v1169_v55 }
 0x1c9   : > { %v1209_v57 = vmax.f32 %v1170_v56, 0.0 }
 0x1cb   : > { %1269 = vmatmul.f32.gmra.mxu1 %v1209_v57 }
 0x1ce   : > { %v1172_v58 = vpop.f32.mrf.mxu0 }
 0x1cf   : > { %v1173_v59 = vadd.f32 %v1879_v44, %v1172_v58 }
 0x1d1   : > { %v1210_v60 = vmax.f32 %v1173_v59, 0.0 }
 0x1d3   : > { %1272 = vmatmul.f32.gmra.mxu1 %v1210_v60 }
 0x1d6   : > { %v1175_v61 = vpop.f32.mrf.mxu0 }
 0x1d7   : > { %v1176_v62 = vadd.f32 %v1879_v44, %v1175_v61 }
 0x1d9   : > { %v1211_v63 = vmax.f32 %v1176_v62, 0.0 }
 0x1db   : > { %1275 = vmatmul.f32.gmra.mxu1 %v1211_v63 }
 0x1de   : > { %v1178_v0 = vpop.f32.mrf.mxu0 }
 0x1df   : > { %v1179_v1 = vadd.f32 %v1879_v44, %v1178_v0 }
 0x1e1   : > { %v1212_v2 = vmax.f32 %v1179_v1, 0.0 }
 0x1e3   : > { %1278 = vmatmul.f32.gmra.mxu1 %v1212_v2 }
 0x1e6   : > { %v1181_v15 = vpop.f32.mrf.mxu0 }
 0x1e7   : > { %v1182_v3 = vadd.f32 %v1879_v44, %v1181_v15 }
 0x1e9   : > { %v1213_v4 = vmax.f32 %v1182_v3, 0.0 }
 0x1eb   : > { %1281 = vmatmul.f32.gmra.mxu1 %v1213_v4 }
 0x1ee   : > { %v1184_v6 = vpop.f32.mrf.mxu0 }
 0x1ef   : > { %v1185_v7 = vadd.f32 %v1879_v44, %v1184_v6 }
 0x1f1   : > { %v1214_v8 = vmax.f32 %v1185_v7, 0.0 }
 0x1f3   : > { %1284 = vmatmul.f32.gmra.mxu1 %v1214_v8 }
 0x1f6   : > { %v1187_v9 = vpop.f32.mrf.mxu0 }
 0x1f7   : > { %v1188_v11 = vadd.f32 %v1879_v44, %v1187_v9 }
 0x1f9   : > { %v1215_v20 = vmax.f32 %v1188_v11, 0.0 }
 0x1fb   : > { %1287 = vmatmul.f32.gmra.mxu1 %v1215_v20 }
 0x1fe   : > { %v1190_v28 = vpop.f32.mrf.mxu0 }
 0x1ff   : > { %v1191_v29 = vadd.f32 %v1879_v44, %v1190_v28 }
 0x201   : > { %v1216_v14 = vmax.f32 %v1191_v29, 0.0 }
 0x203   : > { %1290 = vmatmul.f32.gmra.mxu1 %v1216_v14 }
 0x206   : > { %v1193_v16 = vpop.f32.mrf.mxu0 }
 0x207   : > { %v1194_v17 = vadd.f32 %v1879_v44, %v1193_v16 }
 0x209   : > { %v1217_v18 = vmax.f32 %v1194_v17, 0.0 }
 0x20b   : > { %1293 = vmatmul.f32.gmra.mxu1 %v1217_v18 }
 0x20e   : > { %v1196_v19 = vpop.f32.mrf.mxu0 }
 0x20f   : > { %v1197_v21 = vadd.f32 %v1879_v44, %v1196_v19 }
 0x211   : > { %v1218_v22 = vmax.f32 %v1197_v21, 0.0 }
 0x213   : > { %1296 = vmatmul.f32.gmra.mxu1 %v1218_v22 }
 0x216   : > { %v1199_v46 = vpop.f32.mrf.mxu0 }
 0x217   : > { %v1200_v47 = vadd.f32 %v1879_v44, %v1199_v46 }
 0x219   : > { %v1219_v24 = vmax.f32 %v1200_v47, 0.0 }
 0x21b   : > { %1299 = vmatmul.f32.gmra.mxu1 %v1219_v24 }
 0x21e   : > { %v1202_v25 = vpop.f32.mrf.mxu0 }
 0x21f   : > { %v1203_v26 = vadd.f32 %v1879_v44, %v1202_v25 }
 0x221   : > { %v1220_v30 = vmax.f32 %v1203_v26, 0.0 }
 0x223   : > { %1302 = vmatmul.f32.gmra.mxu1 %v1220_v30 }
 0x228   : > { %v1258_v23 = vpop.f32.mrf.mxu1 }
 0x229   : > { %v1259_v12 = vadd.f32 %v2421_v31, %v1258_v23 }
 0x22b   : > { %v1306_v13 = vmax.f32 %v1259_v12, 0.0 }
 0x22d   : > { %1322 = vst [vmem:[%s2425_s20] sm:$0xff] %v1306_v13 }
 0x230   : > { %v1261_v33 = vpop.f32.mrf.mxu1 }
 0x231   : > { %v1262_v36 = vadd.f32 %v2421_v31, %v1261_v33 }
 0x233   : > { %v1307_v37 = vmax.f32 %v1262_v36, 0.0 }
 0x235   : > { %1323 = vst [vmem:[%s2425_s20 + $0x8] sm:$0xff] %v1307_v37 }
 0x238   : > { %v1264_v38 = vpop.f32.mrf.mxu1 }
 0x239   : > { %v1265_v34 = vadd.f32 %v2421_v31, %v1264_v38 }
 0x23b   : > { %v1308_v35 = vmax.f32 %v1265_v34, 0.0 }
 0x23d   : > { %1324 = vst [vmem:[%s2425_s20 + $0x10] sm:$0xff] %v1308_v35 }
 0x240   : > { %v1267_v27 = vpop.f32.mrf.mxu1 }
 0x241   : > { %v1268_v40 = vadd.f32 %v2421_v31, %v1267_v27 }
 0x243   : > { %v1309_v41 = vmax.f32 %v1268_v40, 0.0 }
 0x245   : > { %1325 = vst [vmem:[%s2425_s20 + $0x18] sm:$0xff] %v1309_v41 }
 0x248   : > { %v1270_v42 = vpop.f32.mrf.mxu1 }
 0x249   : > { %v1271_v43 = vadd.f32 %v2421_v31, %v1270_v42 }
 0x24b   : > { %v1310_v44 = vmax.f32 %v1271_v43, 0.0 }
 0x24d   : > { %1326 = vst [vmem:[%s2425_s20 + $0x20] sm:$0xff] %v1310_v44 }
 0x250   : > { %v1273_v5 = vpop.f32.mrf.mxu1 }
 0x251   : > { %v1274_v32 = vadd.f32 %v2421_v31, %v1273_v5 }
 0x253   : > { %v1311_v45 = vmax.f32 %v1274_v32, 0.0 }
 0x255   : > { %1327 = vst [vmem:[%s2425_s20 + $0x28] sm:$0xff] %v1311_v45 }
 0x258   : > { %v1276_v48 = vpop.f32.mrf.mxu1 }
 0x259   : > { %v1277_v49 = vadd.f32 %v2421_v31, %v1276_v48 }
 0x25b   : > { %v1312_v50 = vmax.f32 %v1277_v49, 0.0 }
 0x25d   : > { %1328 = vst [vmem:[%s2425_s20 + $0x30] sm:$0xff] %v1312_v50 }
 0x260   : > { %v1279_v51 = vpop.f32.mrf.mxu1 }
 0x261   : > { %v1280_v52 = vadd.f32 %v2421_v31, %v1279_v51 }
 0x263   : > { %v1313_v39 = vmax.f32 %v1280_v52, 0.0 }
 0x265   : > { %1329 = vst [vmem:[%s2425_s20 + $0x38] sm:$0xff] %v1313_v39 }
 0x268   : > { %v1282_v53 = vpop.f32.mrf.mxu1 }
 0x269   : > { %v1283_v54 = vadd.f32 %v2421_v31, %v1282_v53 }
 0x26b   : > { %v1314_v10 = vmax.f32 %v1283_v54, 0.0 }
 0x26d   : > { %1330 = vst [vmem:[%s2425_s20 + $0x40] sm:$0xff] %v1314_v10 }
 0x270   : > { %v1285_v55 = vpop.f32.mrf.mxu1 }
 0x271   : > { %v1286_v56 = vadd.f32 %v2421_v31, %v1285_v55 }
 0x273   : > { %v1315_v57 = vmax.f32 %v1286_v56, 0.0 }
 0x275   : > { %1331 = vst [vmem:[%s2425_s20 + $0x48] sm:$0xff] %v1315_v57 }
 0x278   : > { %v1288_v58 = vpop.f32.mrf.mxu1 }
 0x279   : > { %v1289_v59 = vadd.f32 %v2421_v31, %v1288_v58 }
 0x27b   : > { %v1316_v60 = vmax.f32 %v1289_v59, 0.0 }
 0x27d   : > { %1332 = vst [vmem:[%s2425_s20 + $0x50] sm:$0xff] %v1316_v60 }
 0x280   : > { %v1291_v61 = vpop.f32.mrf.mxu1 }
 0x281   : > { %v1292_v62 = vadd.f32 %v2421_v31, %v1291_v61 }
 0x283   : > { %v1317_v63 = vmax.f32 %v1292_v62, 0.0 }
 0x285   : > { %1333 = vst [vmem:[%s2425_s20 + $0x58] sm:$0xff] %v1317_v63 }
 0x288   : > { %v1294_v0 = vpop.f32.mrf.mxu1 }
 0x289   : > { %v1295_v1 = vadd.f32 %v2421_v31, %v1294_v0 }
 0x28b   : > { %v1318_v2 = vmax.f32 %v1295_v1, 0.0 }
 0x28d   : > { %1334 = vst [vmem:[%s2425_s20 + $0x60] sm:$0xff] %v1318_v2 }
 0x290   : > { %v1297_v15 = vpop.f32.mrf.mxu1 }
 0x291   : > { %v1298_v3 = vadd.f32 %v2421_v31, %v1297_v15 }
 0x293   : > { %v1319_v4 = vmax.f32 %v1298_v3, 0.0 }
 0x295   : > { %1335 = vst [vmem:[%s2425_s20 + $0x68] sm:$0xff] %v1319_v4 }
 0x298   : > { %v1300_v6 = vpop.f32.mrf.mxu1 }
 0x299   : > { %v1301_v7 = vadd.f32 %v2421_v31, %v1300_v6 }
 0x29b   : > { %v1320_v8 = vmax.f32 %v1301_v7, 0.0 }
 0x29d   : > { %1336 = vst [vmem:[%s2425_s20 + $0x70] sm:$0xff] %v1320_v8 }
 0x2a0   : > { %v1303_v9 = vpop.f32.mrf.mxu1 }
 0x2a1   : > { %v1304_v11 = vadd.f32 %v2421_v31, %v1303_v9 }
 0x2a3   : > { %v1321_v20 = vmax.f32 %v1304_v11, 0.0 }
 0x2a5   : > { %1337 = vst [vmem:[%s2425_s20 + $0x78] sm:$0xff] %v1321_v20 }
 0x2a6   : > { %2058 = shalt.err (!%p2055_p0)
}
 0x2a7   : > { %s2141_s0 = smov 128   ;;  %s2142_s13 = smov 8  }
 0x2a8   : > { %1786 = dma.vmem_to_hbm [thread:$0]  (%p2280_p7), %s1352_s5, 2048, %s1354_s3, %s1339_s14, %s2141_s0, %s2141_s0, %s2142_s13  }
 0x2a9 PF: > { %s1368_s16 = sand.u32 1, %s2109_s24   ;;  %p1806_p3 = pnand %p1491_p11, %p2228_p6 }
 0x2aa   : > { %s1369_s11 = scalar_lea.sflag [#allocation5], %s1368_s16 }
 0x2ab   : > { %p1807_p5 = pneg %p1806_p3 }
 0x2ad   : > { %2104 = dma.done.wait (%p1807_p5), %s1369_s11, 2048  }
 0x2ae   : > { %2106 = vsyncadd (%p1807_p5), %s1369_s11, 4294965248  ;;  %s23_s29 = sadd.s32 1, %s2129_s29   ;;  %s2522_s17 = sld [smem:[#allocation19_spill]] }
 0x2af   : > { %p20_p9 = scmp.ge.s32.totalorder %s23_s29, 4   ;;  %s2523_s24 = smov %s2113_s25 }
 0x2b0   : > { %s2524_s25 = smov %s2117_s26  ;;  %s2525_s26 = smov %s2290_s23 }
 0x2b1   : > { %s2526_s27 = smov %s2125_s28  ;;  %22 = sbr.rel (!%p20_p9) target bundleno = 12 (0xc), region = 120 }
 0x2b4   : > { %s2527_s28 = smov %s2522_s17 }
 0x2b6   :  { %1375 = vsyncpa [#allocation4], 1 }
 0x2b7   :  { %1377 = vsyncpa [#allocation4 + $0x1], 1 }
 0x2b8   :  { %1378 = vsyncpa [#allocation7], 1 }
 0x2b9   :  { %1379 = vsyncpa [#allocation11], 1 }
 0x2ba   :  { %1380 = vsyncpa [#allocation5], 1 }
 0x2bb   :  { %1382 = vsyncpa [#allocation5 + $0x1], 1 }

</bundles_post_ra>
